<compile_context>
chip_gen: v5e
topology: v5e:2x2
jax: 0.10.0
libtpu: 0.0.40
codegen_flags: <defaults>
</compile_context>

<pallas_src>
import functools
import math

import jax
import jax.numpy as jnp
from jax.experimental import pallas as pl
from jax.experimental.pallas import tpu as pltpu


def _round_up(x, m):
    return (x + m - 1) // m * m


def _pick_tile_m(m_total, max_tile=1024):
    """Largest 128-multiple tile <= max_tile that still yields >= 2 grid steps
    (v7x has 2 TensorCores); never below 128."""
    tm = max_tile
    while tm > 128 and (m_total + tm - 1) // tm < 2:
        tm //= 2
    return tm


def _masked_convt_kernel(kpos_ref, chosen_ref, x_ref, w_ref, o_ref, xpad_ref,
                         *, k_real):
    # kpos_ref:   (K, 1)     int32  kernel position (k % kh*kw) per patch row
    # chosen_ref: (1, TM)    int32  dropped kernel position per patch column
    # x_ref:      (K, TM)    bf16   patches^T tile (M on lanes, K unpadded)
    # w_ref:      (Osub, Kp) bf16   weight, K zero-padded to Kp=128 (tiny)
    # o_ref:      (Osub, TM) f32    transposed output tile (lane-dense stores)
    # xpad_ref:   (Kp, TM)   bf16   VMEM scratch: K-padded masked patch tile
    keep = kpos_ref[...] != chosen_ref[...]            # (K, TM) via broadcast
    # Zero the whole scratch every step: with a "parallel" grid axis the
    # second TensorCore never executes program_id == 0, so a one-time init
    # would leave its pad rows uninitialized.  Cost is a few vregs of stores.
    xpad_ref[...] = jnp.zeros_like(xpad_ref)
    xv = x_ref[...]
    xpad_ref[:k_real, :] = jnp.where(keep, xv, jnp.zeros_like(xv))
    o_ref[...] = jnp.dot(w_ref[...], xpad_ref[...],
                         preferred_element_type=jnp.float32)


def masked_conv_matmul_t(kpos, chosen, patches_t, w_pad, tile_m):
    """out_t[o, m] = sum_k w_pad[o, k] * patches_t[k, m] * (kpos[k] != chosen[m])."""
    k_real, m_pad = patches_t.shape
    o_sub, k_pad = w_pad.shape
    assert m_pad % tile_m == 0 and tile_m % 128 == 0
    kernel = functools.partial(_masked_convt_kernel, k_real=k_real)
    return pl.pallas_call(
        kernel,
        out_shape=jax.ShapeDtypeStruct((o_sub, m_pad), jnp.float32),
        grid_spec=pltpu.PrefetchScalarGridSpec(
            num_scalar_prefetch=0,
            grid=(m_pad // tile_m,),
            in_specs=[
                pl.BlockSpec((k_real, 1), lambda m: (0, 0)),      # kpos (invariant)
                pl.BlockSpec((1, tile_m), lambda m: (0, m)),      # chosen strip
                pl.BlockSpec((k_real, tile_m), lambda m: (0, m)), # patches^T tile
                pl.BlockSpec((o_sub, k_pad), lambda m: (0, 0)),   # weight (invariant)
            ],
            out_specs=pl.BlockSpec((o_sub, tile_m), lambda m: (0, m)),
            scratch_shapes=[pltpu.VMEM((k_pad, tile_m), jnp.bfloat16)],
        ),
        compiler_params=pltpu.CompilerParams(
            dimension_semantics=("parallel",),
            vmem_limit_bytes=48 * 1024 * 1024,
        ),
    )(kpos, chosen, patches_t, w_pad)


def random_conv2d_forward(x, weight, mask_key, kernel_size, stride=1,
                          padding=0, max_tile_m=1024):
    kh, kw = kernel_size
    kk = kh * kw
    b, c, h, w = x.shape
    out_ch = weight.shape[0]
    out_h = (h + 2 * padding - kh) // stride + 1
    out_w = (w + 2 * padding - kw) // stride + 1
    L = out_h * out_w
    M = b * L
    K = c * kk

    tile_m = _pick_tile_m(M, max_tile_m)
    m_pad = _round_up(M, tile_m)
    k_pad = 128                       # contraction pad lives only in VMEM / weight
    o_sub = _round_up(out_ch, 8)

    # --- patches^T (K, M) in bf16, built directly in the kernel's layout ---
    xb = x.astype(jnp.bfloat16)
    if padding:
        xb = jnp.pad(xb, ((0, 0), (0, 0), (padding, padding), (padding, padding)))
    cols = []
    for i in range(kh):
        for j in range(kw):
            cols.append(xb[:, :, i:i + stride * out_h:stride,
                               j:j + stride * out_w:stride])
    pt = jnp.stack(cols, axis=2)                              # (b, c, kk, oh, ow)
    pt = jnp.transpose(pt, (1, 2, 0, 3, 4)).reshape(K, M)     # k=c*kk+p, m=b*L+l
    patches_t = jnp.pad(pt, ((0, 0), (0, m_pad - M)))

    # --- dropped kernel position per patch (same mask for every batch elem) ---
    chosen_l = jax.random.randint(mask_key, (L,), 0, kk, dtype=jnp.int32)
    chosen = jnp.tile(chosen_l, b)                            # (M,), batch-outer
    chosen_p = jnp.zeros((1, m_pad), jnp.int32).at[0, :M].set(chosen)

    # --- kernel position per patch row, hoisted out of the kernel ---
    kpos = (jnp.arange(K, dtype=jnp.int32) % kk).reshape(K, 1)

    # --- weight (O, K), K ordering matches the unfold; pad K->128, O->8k ---
    w_t = weight.reshape(out_ch, K).astype(jnp.bfloat16)
    w_pad = jnp.zeros((o_sub, k_pad), jnp.bfloat16).at[:out_ch, :K].set(w_t)

    out_t = masked_conv_matmul_t(kpos, chosen_p, patches_t, w_pad, tile_m)

    out = out_t[:out_ch, :M].reshape(out_ch, b, L)
    out = jnp.transpose(out, (1, 0, 2)).reshape(b, out_ch, out_h, out_w)
    return out


if __name__ == "__main__":
    # Small shapes consistent with the module: NCHW input, 3x3 conv.
    B, C_IN, H, W = 2, 4, 16, 16
    C_OUT, KH, KW = 8, 3, 3
    STRIDE, PADDING = 1, 0

    key = jax.random.PRNGKey(0)
    k_x, k_w, k_mask = jax.random.split(key, 3)

    x = jax.random.normal(k_x, (B, C_IN, H, W), dtype=jnp.float32)

    # Deterministic kaiming_uniform_(a=sqrt(5)) equivalent: bound = 1/sqrt(fan_in)
    fan_in = C_IN * KH * KW
    bound = 1.0 / math.sqrt(fan_in)
    weight = jax.random.uniform(k_w, (C_OUT, C_IN, KH, KW),
                                minval=-bound, maxval=bound, dtype=jnp.float32)
    # bias Parameter exists in the torch module but forward() never adds it.

    fwd = jax.jit(functools.partial(random_conv2d_forward,
                                    kernel_size=(KH, KW),
                                    stride=STRIDE, padding=PADDING))
    out = jax.block_until_ready(fwd(x, weight, k_mask))

    # --- pure-JAX reference using the same bf16-rounded operands ---
    oh, ow = H - KH + 1, W - KW + 1
    xb = x.astype(jnp.bfloat16).astype(jnp.float32)
    cols = [xb[:, :, i:i + oh, j:j + ow] for i in range(KH) for j in range(KW)]
    pr = jnp.stack(cols, axis=2).reshape(B, C_IN * KH * KW, oh * ow)  # (B,K,L)
    pr = jnp.transpose(pr, (0, 2, 1))                                 # (B,L,K)
    chosen = jax.random.randint(k_mask, (oh * ow,), 0, KH * KW, dtype=jnp.int32)
    base = 1.0 - jax.nn.one_hot(chosen, KH * KW, dtype=jnp.float32)   # (L,kk)
    mask_ref = jnp.tile(base, (1, C_IN))                              # (L,K)
    w_bf = weight.reshape(C_OUT, -1).astype(jnp.bfloat16).astype(jnp.float32)
    ref = jnp.einsum("blk,lk,ok->bol", pr, mask_ref, w_bf, precision="highest")
    ref = ref.reshape(B, C_OUT, oh, ow)

    assert out.shape == (B, C_OUT, oh, ow), out.shape
    err = float(jnp.max(jnp.abs(out - ref)))
    assert jnp.allclose(out, ref, atol=1e-4, rtol=1e-4), err
    print("KERNEL_OK")
</pallas_src>

<mosaic_0001>
module attributes {stable_mosaic.version = 11 : i64} {
  func.func @_masked_convt_kernel(%arg0: i32, %arg1: memref<36x1xi32, #tpu.memory_space<vmem>>, %arg2: memref<1x256xi32, #tpu.memory_space<vmem>>, %arg3: memref<36x256xbf16, #tpu.memory_space<vmem>>, %arg4: memref<8x128xbf16, #tpu.memory_space<vmem>>, %arg5: memref<8x256xf32, #tpu.memory_space<vmem>>, %arg6: memref<128x256xbf16, #tpu.memory_space<vmem>>) attributes {dimension_semantics = [#tpu.dimension_semantics<parallel>], iteration_bounds = array<i64: 2>, scalar_prefetch = 0 : i64, scratch_operands = 1 : i64, tpu.core_type = #tpu.core_type<tc>, window_params = [{pipeline_mode = #tpu.pipeline_mode<synchronous>, transform_indices = @transform_0, window_bounds = array<i64: 36, 1>}, {transform_indices = @transform_1, window_bounds = array<i64: 1, 256>}, {transform_indices = @transform_2, window_bounds = array<i64: 36, 256>}, {pipeline_mode = #tpu.pipeline_mode<synchronous>, transform_indices = @transform_3, window_bounds = array<i64: 8, 128>}, {transform_indices = @transform_4, window_bounds = array<i64: 8, 256>}]} {
    %c0 = arith.constant 0 : index
    %c0_0 = arith.constant 0 : index
    %0 = vector.load %arg1[%c0, %c0_0] : memref<36x1xi32, #tpu.memory_space<vmem>>, vector<36x1xi32>
    %c0_1 = arith.constant 0 : index
    %c0_2 = arith.constant 0 : index
    %1 = vector.load %arg2[%c0_1, %c0_2] : memref<1x256xi32, #tpu.memory_space<vmem>>, vector<1x256xi32>
    %2 = vector.broadcast %0 : vector<36x1xi32> to vector<36x256xi32>
    %3 = vector.broadcast %1 : vector<1x256xi32> to vector<36x256xi32>
    %4 = arith.cmpi ne, %2, %3 : vector<36x256xi32>
    %cst = arith.constant 0.000000e+00 : bf16
    %5 = vector.broadcast %cst : bf16 to vector<128x256xbf16>
    %c0_3 = arith.constant 0 : index
    %c0_4 = arith.constant 0 : index
    %6 = vector.load %arg6[%c0_3, %c0_4] : memref<128x256xbf16, #tpu.memory_space<vmem>>, vector<128x256xbf16>
    tpu.vector_store %arg6[%c0_3, %c0_4], %5 {strides = array<i32>} : memref<128x256xbf16, #tpu.memory_space<vmem>>, vector<128x256xbf16>,
    %c0_5 = arith.constant 0 : index
    %c0_6 = arith.constant 0 : index
    %7 = vector.load %arg3[%c0_5, %c0_6] : memref<36x256xbf16, #tpu.memory_space<vmem>>, vector<36x256xbf16>
    %cst_7 = arith.constant 0.000000e+00 : bf16
    %8 = vector.broadcast %cst_7 : bf16 to vector<36x256xbf16>
    %9 = arith.select %4, %7, %8 : vector<36x256xi1>, vector<36x256xbf16>
    %c0_8 = arith.constant 0 : index
    %c0_9 = arith.constant 0 : index
    %10 = vector.load %arg6[%c0_8, %c0_9] : memref<128x256xbf16, #tpu.memory_space<vmem>>, vector<36x256xbf16>
    tpu.vector_store %arg6[%c0_8, %c0_9], %9 {strides = array<i32>} : memref<128x256xbf16, #tpu.memory_space<vmem>>, vector<36x256xbf16>,
    %c0_10 = arith.constant 0 : index
    %c0_11 = arith.constant 0 : index
    %11 = vector.load %arg4[%c0_10, %c0_11] : memref<8x128xbf16, #tpu.memory_space<vmem>>, vector<8x128xbf16>
    %c0_12 = arith.constant 0 : index
    %c0_13 = arith.constant 0 : index
    %12 = vector.load %arg6[%c0_12, %c0_13] : memref<128x256xbf16, #tpu.memory_space<vmem>>, vector<128x256xbf16>
    %cst_14 = arith.constant dense<0.000000e+00> : vector<8x256xf32>
    %13 = tpu.matmul %11, %12, %cst_14 {dimension_numbers = #tpu.dot_dimension_numbers<[1], [0], [0], [1], [0, 0, 1, 1], [], []>} : vector<8x128xbf16>, vector<128x256xbf16>, vector<8x256xf32> -> vector<8x256xf32>
    %c0_15 = arith.constant 0 : index
    %c0_16 = arith.constant 0 : index
    %14 = vector.load %arg5[%c0_15, %c0_16] : memref<8x256xf32, #tpu.memory_space<vmem>>, vector<8x256xf32>
    tpu.vector_store %arg5[%c0_15, %c0_16], %13 {strides = array<i32>} : memref<8x256xf32, #tpu.memory_space<vmem>>, vector<8x256xf32>,
    return
  }
  func.func @transform_0(%arg0: i32) -> (i32, i32) {
    %c0_i32 = arith.constant 0 : i32
    %c0_i32_0 = arith.constant 0 : i32
    %c0_i32_1 = arith.constant 0 : i32
    return %c0_i32, %c0_i32_0 : i32, i32
  }
  func.func @transform_1(%arg0: i32) -> (i32, i32) {
    %c0_i32 = arith.constant 0 : i32
    %c0_i32_0 = arith.constant 0 : i32
    return %c0_i32, %arg0 : i32, i32
  }
  func.func @transform_2(%arg0: i32) -> (i32, i32) {
    %c0_i32 = arith.constant 0 : i32
    %c0_i32_0 = arith.constant 0 : i32
    return %c0_i32, %arg0 : i32, i32
  }
  func.func @transform_3(%arg0: i32) -> (i32, i32) {
    %c0_i32 = arith.constant 0 : i32
    %c0_i32_0 = arith.constant 0 : i32
    %c0_i32_1 = arith.constant 0 : i32
    return %c0_i32, %c0_i32_0 : i32, i32
  }
  func.func @transform_4(%arg0: i32) -> (i32, i32) {
    %c0_i32 = arith.constant 0 : i32
    %c0_i32_0 = arith.constant 0 : i32
    return %c0_i32, %arg0 : i32, i32
  }
}

</mosaic_0001>

<bundles_post_ra>
// kernel: random_conv2d_forward.1
= control target key start
LH: loop header
LB: loop body
LE: loop exit
PB: predicated region body
PF: predicated region fallthrough
CT: control target
= control target key end

     0   :  { %s710_s15 = smov 0   ;;  %s712_s16 = smov 0   ;;  %s794_s0 = inlined_call_operand.vmem [shape: s32[36,1], index: 0, kind: input, shape index: {}]   ;;  %s795_s1 = inlined_call_operand.vmem [shape: s32[1,512], index: 1, kind: input, shape index: {}]   ;;  %s796_s2 = inlined_call_operand.vmem [shape: bf16[36,512], index: 2, kind: input, shape index: {}]   ;;  %s797_s3 = inlined_call_operand.vmem [shape: bf16[8,128], index: 3, kind: input, shape index: {}]   ;;  %s798_s4 = inlined_call_operand.vmem [shape: f32[8,512], index: 4, kind: output, shape index: {}]  }
   0x1   :  { %s714_s17 = smov 0  }
   0x2 LB: > { %s537_s18 = sadd.s32 4294967295, %s682_s17   ;;  %s727_s19 = sadd.s32 1, %s682_s17   ;;  %s682_s17 = sphi %s714_s17, %s801_s17   ;;  %s678_s16 = sphi %s712_s16, %s800_s16   ;;  %s674_s15 = sphi %s710_s15, %s799_s15  }
   0x3   : > { %s65_s20 = ssub.s32 %s682_s17, %s727_s19  ;;  %s68_s21 = sadd.s32 1, %s678_s16 }
   0x4   : > { %p66_p0 = scmp.eq.s32.totalorder %s65_s20, 0  ;;  %p75_p1 = scmp.ne.s32.totalorder %s678_s16, %s674_s15 }
   0x5   : > { %p76_p2 = scmp.eq.s32.totalorder %s682_s17, 0  ;;  %p540_p4 = scmp.ge.s32.totalorder %s682_s17, 2 }
   0x6   : > { %s736_s22 = scalar_select %p66_p0, %s678_s16, %s68_s21  }
   0x7   : > { %p77_p3 = por %p76_p2, %p75_p1  ;;  %154 = sbr.rel (%p540_p4) target bundleno = 21 (0x15), region = 24 }
   0xc   : > { %165 = sbr.rel (!%p77_p3) target bundleno = 21 (0x15), region = 32  ;;  %s167_s23 = sand.u32 (%p77_p3), 1, %s678_s16  }
   0xd   : > { %s613_s24 = sshll.u32 (%p77_p3), %s682_s17, 3  ;;  %s630_s25 = smul.u32 (%p77_p3), 40, %s167_s23 }
   0xe   : > { %s172_s28 = scalar_lea.vmem (%p77_p3), %s796_s2, %s613_s24 }
   0xf   : > { %v209_v0 = vld [vmem:[%s172_s28] sm:$0xff] (%p77_p3)  ;;  %v211_v1 = vld [vmem:[%s172_s28 + $0x10] sm:$0xff] (%p77_p3)  ;;  %s169_s29 = scalar_lea.vmem (%p77_p3), [#allocation3], %s630_s25 }
  0x10   : > { %v213_v2 = vld [vmem:[%s172_s28 + $0x20] sm:$0xff] (%p77_p3)  ;;  %210 = vst [vmem:[%s169_s29] sm:$0xff] (%p77_p3), %v209_v0  ;;  %v215_v3 = vld [vmem:[%s172_s28 + $0x30] sm:$0xff] (%p77_p3) }
  0x11   : > { %212 = vst [vmem:[%s169_s29 + $0x8] sm:$0xff] %v211_v1  ;;  %v217_v4 = vld [vmem:[%s172_s28 + $0x40] sm:$0xff] }
  0x12   : > { %214 = vst [vmem:[%s169_s29 + $0x10] sm:$0xff] %v213_v2 }
  0x13   : > { %216 = vst [vmem:[%s169_s29 + $0x18] sm:$0xff] %v215_v3 }
  0x14   : > { %218 = vst [vmem:[%s169_s29 + $0x20] sm:$0xff] %v217_v4 }
  0x15 PF: > { %p543_p5 = scmp.ge.s32.totalorder %s682_s17, 1  ;;  %p223_p6 = scmp.lt.s32.totalorder %s682_s17, 3 }
  0x17   : > { %p224_p7 = pnand %p543_p5, %p223_p6 }
  0x18   : > { %s544_s14 = sshll.u32 (!%p224_p7), %s537_s18, 1  ;;  %s230_s20 = sand.u32 (!%p224_p7), 1, %s674_s15  }
  0x19   : > { %227 = sbr.rel (%p224_p7) target bundleno = 309 (0x135), region = 70  ;;  %p260_p8 = scmp.lt.s32.totalorder (!%p224_p7), %s544_s14, 3 }
  0x1a   : > { %s631_s17 = smul.u32 (!%p224_p7), 40, %s230_s20 }
  0x1c   : > { %s770_s15 = scalar_lea.vmem (!%p224_p7), [#allocation3], %s631_s17 }
  0x1e   : > { %v276_v5 = vld [vmem:[%s794_s0 + $0x20] sm:$0xf]  ;;  %v275_v6 = vld [vmem:[%s794_s0 + $0x18] sm:$0xff]  ;;  %v684_v7 = vmov 0   ;;  %v273_v8 = vld [vmem:[%s794_s0 + $0x8] sm:$0xff]  ;;  %s803_s14 = smov (!%p260_p8, %s544_s14), 3 }
  0x1f   : > { %658 = vset.pattern.permute.xlu1 %v684_v7  ;;  %309 = vst [vmem:[#allocation2 + $0x20] sm:$0xff] %v684_v7  ;;  %657 = vset.pattern.permute.xlu0 %v684_v7  ;;  %v274_v9 = vld [vmem:[%s794_s0 + $0x10] sm:$0xff]  ;;  %v272_v10 = vld [vmem:[%s794_s0] sm:$0xff]  ;;  %s262_s24 = scalar_lea.vmem %s795_s1, %s803_s14  ;;  %s546_s26 = sshll.u32 %s803_s14, 3 }
  0x20   : > { %310 = vst [vmem:[#allocation2 + $0x28] sm:$0xff] %v684_v7  ;;  %291 = vperm.xlu0 %657, %v276_v5   ;;  %288 = vperm.xlu1 %658, %v275_v6   ;;  %v277_v35 = vld [vmem:[%s262_s24] sm:$0x3]  ;;  %v322_v44 = vld [vmem:[%s770_s15 + $0x8] sm:$0xff]  ;;  %v323_v54 = vld [vmem:[%s770_s15 + $0x10] sm:$0xff]  ;;  %s269_s29 = scalar_lea.vmem %s798_s4, %s546_s26 }
  0x21   : > { %311 = vst [vmem:[#allocation2 + $0x30] sm:$0xff] %v684_v7  ;;  %659 = vset.pattern.permute.xlu2 %v684_v7  ;;  %v293_v39 = vperm.slane %v277_v35, 0  ;;  %v294_v40 = vperm.slane %v277_v35, 1  ;;  %v325_v48 = vld [vmem:[%s770_s15 + $0x20] sm:$0x33]  ;;  %v324_v50 = vld [vmem:[%s770_s15 + $0x18] sm:$0xff] }
  0x22   : > { %312 = vst [vmem:[#allocation2 + $0x38] sm:$0xff] %v684_v7  ;;  %282 = vperm.xlu2 %659, %v273_v8   ;;  %v321_v56 = vld [vmem:[%s770_s15] sm:$0xff] }
  0x23   : > { %313 = vst [vmem:[#allocation2 + $0x40] sm:$0xff] %v684_v7 }
  0x24   : > { %314 = vst [vmem:[#allocation2 + $0x48] sm:$0xff] %v684_v7 }
  0x25   : > { %315 = vst [vmem:[#allocation2 + $0x50] sm:$0xff] %v684_v7 }
  0x26   : > { %316 = vst [vmem:[#allocation2 + $0x58] sm:$0xff] %v684_v7 }
  0x27   : > { %317 = vst [vmem:[#allocation2 + $0x60] sm:$0xff] %v684_v7  ;;  %v619_v57 = vld [vmem:[#allocation2 + $0x24] sm:$0xf0]  ;;  %v567_v58 = vld [vmem:[#allocation2 + $0x28] sm:$0xf0] }
  0x28   : > { %318 = vst [vmem:[#allocation2 + $0x68] sm:$0xff] %v684_v7  ;;  %285 = vperm.xlu0 %657, %v274_v9   ;;  %279 = vperm.xlu1 %658, %v272_v10   ;;  %v573_v36 = vld [vmem:[#allocation2 + $0x30] sm:$0xf]  ;;  %v620_v38 = vld [vmem:[#allocation2 + $0x34] sm:$0xf] }
  0x29   : > { %319 = vst [vmem:[#allocation2 + $0x70] sm:$0xff] %v684_v7  ;;  %v621_v37 = vld [vmem:[#allocation2 + $0x34] sm:$0xf0]  ;;  %v575_v42 = vld [vmem:[#allocation2 + $0x38] sm:$0xf0] }
  0x2a   : > { %320 = vst [vmem:[#allocation2 + $0x78] sm:$0xff] %v684_v7  ;;  %v581_v29 = vld [vmem:[#allocation2 + $0x40] sm:$0xf]  ;;  %v622_v31 = vld [vmem:[#allocation2 + $0x44] sm:$0xf]  ;;  %v574_v41 = vor.u32 %v621_v37, %v573_v36  ;;  %v578_v45 = vor.u32 %v620_v38, %v575_v42 }
  0x2b   : > { %v623_v30 = vld [vmem:[#allocation2 + $0x44] sm:$0xf0]  ;;  %v583_v33 = vld [vmem:[#allocation2 + $0x48] sm:$0xf0] }
  0x2c   : > { %v589_v23 = vld [vmem:[#allocation2 + $0x50] sm:$0xf]  ;;  %v624_v26 = vld [vmem:[#allocation2 + $0x54] sm:$0xf]  ;;  %v582_v32 = vor.u32 %v623_v30, %v581_v29  ;;  %v586_v34 = vor.u32 %v622_v31, %v583_v33 }
  0x2d   : > { %v625_v24 = vld [vmem:[#allocation2 + $0x54] sm:$0xf0]  ;;  %v591_v27 = vld [vmem:[#allocation2 + $0x58] sm:$0xf0] }
  0x2e   : > { %v597_v11 = vld [vmem:[#allocation2 + $0x60] sm:$0xf]  ;;  %v626_v12 = vld [vmem:[#allocation2 + $0x64] sm:$0xf]  ;;  %v590_v25 = vor.u32 %v625_v24, %v589_v23  ;;  %v594_v28 = vor.u32 %v624_v26, %v591_v27 }
  0x2f   : > { %v627_v15 = vld [vmem:[#allocation2 + $0x64] sm:$0xf0]  ;;  %v599_v18 = vld [vmem:[#allocation2 + $0x68] sm:$0xf0] }
  0x30   : > { %v605_v13 = vld [vmem:[#allocation2 + $0x70] sm:$0xf]  ;;  %v628_v14 = vld [vmem:[#allocation2 + $0x74] sm:$0xf]  ;;  %v598_v21 = vor.u32 %v627_v15, %v597_v11  ;;  %v602_v22 = vor.u32 %v626_v12, %v599_v18 }
  0x31   : > { %v629_v16 = vld [vmem:[#allocation2 + $0x74] sm:$0xf0]  ;;  %v607_v17 = vld [vmem:[#allocation2 + $0x78] sm:$0xf0] }
  0x32   : > { %v606_v19 = vor.u32 %v629_v16, %v605_v13  ;;  %v610_v20 = vor.u32 %v628_v14, %v607_v17  ;;  %v341_v13 = vld [vmem:[%s797_s3] sm:$0xf] }
  0x34   : > { %438 = vmatpush.bf16.msra.mxu0 %v606_v19  ;;  %451 = vmatpush.bf16.msra.mxu1 %v610_v20 }
  0x38   : > { %439 = vmatpush.bf16.msra.mxu0 %v598_v21  ;;  %452 = vmatpush.bf16.msra.mxu1 %v602_v22 }
  0x3c   : > { %440 = vmatpush.bf16.msra.mxu0 %v590_v25  ;;  %453 = vmatpush.bf16.msra.mxu1 %v594_v28 }
  0x40   : > { %441 = vmatpush.bf16.msra.mxu0 %v582_v32  ;;  %454 = vmatpush.bf16.msra.mxu1 %v586_v34 }
  0x44   : > { %442 = vmatpush.bf16.msra.mxu0 %v574_v41  ;;  %455 = vmatpush.bf16.msra.mxu1 %v578_v45 }
  0x7c   : > { %v283_v43 = vpop.permute.xlu2 %282 }
  0x7d   : > { %vm297_vm0 = vcmp.ne.s32.totalorder %v283_v43, %v293_v39  ;;  %vm298_vm1 = vcmp.ne.s32.totalorder %v283_v43, %v294_v40 }
  0x7e   : > { %vm327_vm2 = vmpackc.low %vm298_vm1, %vm297_vm0 }
  0x7f   : > { %v332_v46 = vsel %vm327_vm2, %v322_v44, 0 }
  0x80   : > { %337 = vst [vmem:[#allocation2 + $0x8] sm:$0xff] %v332_v46 }
  0x87   : > { %v615_v7 = vld [vmem:[#allocation2 + $0x4] sm:$0xf0]  ;;  %v551_v10 = vld [vmem:[#allocation2 + $0x8] sm:$0xf0] }
  0x92   : > { %v292_v47 = vpop.permute.xlu0 %291  ;;  %v289_v49 = vpop.permute.xlu1 %288 }
  0x93   : > { %vm303_vm3 = vcmp.ne.s32.totalorder %v292_v47, %v293_v39  ;;  %vm304_vm4 = vcmp.ne.s32.totalorder %v292_v47, %v294_v40  ;;  %vm301_vm5 = vcmp.ne.s32.totalorder %v289_v49, %v293_v39  ;;  %vm302_vm6 = vcmp.ne.s32.totalorder %v289_v49, %v294_v40 }
  0x94   : > { %vm330_vm7 = vmpackc.low %vm304_vm4, %vm303_vm3 }
  0x95   : > { %v335_v51 = vsel %vm330_vm7, %v325_v48, 0  ;;  %vm329_vm8 = vmpackc.low %vm302_vm6, %vm301_vm5 }
  0x96   : > { %340 = vst [vmem:[#allocation2 + $0x20] sm:$0x33] %v335_v51  ;;  %v334_v52 = vsel %vm329_vm8, %v324_v50, 0 }
  0x97   : > { %339 = vst [vmem:[#allocation2 + $0x18] sm:$0xff] %v334_v52 }
  0x9a   : > { %v286_v53 = vpop.permute.xlu0 %285  ;;  %v280_v55 = vpop.permute.xlu1 %279 }
  0x9b   : > { %vm299_vm9 = vcmp.ne.s32.totalorder %v286_v53, %v293_v39  ;;  %vm300_vm10 = vcmp.ne.s32.totalorder %v286_v53, %v294_v40  ;;  %vm295_vm11 = vcmp.ne.s32.totalorder %v280_v55, %v293_v39  ;;  %vm296_vm12 = vcmp.ne.s32.totalorder %v280_v55, %v294_v40 }
  0x9c   : > { %vm328_vm13 = vmpackc.low %vm300_vm10, %vm299_vm9 }
  0x9d   : > { %v333_v59 = vsel %vm328_vm13, %v323_v54, 0  ;;  %vm326_vm14 = vmpackc.low %vm296_vm12, %vm295_vm11  ;;  %v565_v60 = vld [vmem:[#allocation2 + $0x20] sm:$0xf]  ;;  %v618_v61 = vld [vmem:[#allocation2 + $0x24] sm:$0xf] }
  0x9e   : > { %338 = vst [vmem:[#allocation2 + $0x10] sm:$0xff] %v333_v59  ;;  %v331_v62 = vsel %vm326_vm14, %v321_v56, 0  ;;  %v566_v63 = vor.u32 %v619_v57, %v565_v60  ;;  %v570_v0 = vor.u32 %v618_v61, %v567_v58  ;;  %v617_v1 = vld [vmem:[#allocation2 + $0x14] sm:$0xf0]  ;;  %v559_v4 = vld [vmem:[#allocation2 + $0x18] sm:$0xf0] }
  0x9f   : > { %336 = vst [vmem:[#allocation2] sm:$0xff] %v331_v62 }
  0xa0   : > { %443 = vmatpush.bf16.msra.mxu0 %v566_v63  ;;  %456 = vmatpush.bf16.msra.mxu1 %v570_v0 }
  0xa5   : > { %v557_v2 = vld [vmem:[#allocation2 + $0x10] sm:$0xf]  ;;  %v616_v3 = vld [vmem:[#allocation2 + $0x14] sm:$0xf] }
  0xa6   : > { %v558_v5 = vor.u32 %v617_v1, %v557_v2  ;;  %v562_v6 = vor.u32 %v616_v3, %v559_v4  ;;  %v549_v8 = vld [vmem:[#allocation2] sm:$0xf]  ;;  %v614_v9 = vld [vmem:[#allocation2 + $0x4] sm:$0xf] }
  0xa7   : > { %v550_v11 = vor.u32 %v615_v7, %v549_v8  ;;  %v554_v12 = vor.u32 %v614_v9, %v551_v10 }
  0xa8   : > { %444 = vmatpush.bf16.msra.mxu0 %v558_v5  ;;  %457 = vmatpush.bf16.msra.mxu1 %v562_v6 }
  0xac   : > { %445 = vmatpush.bf16.msra.mxu0 %v550_v11  ;;  %458 = vmatpush.bf16.msra.mxu1 %v554_v12 }
  0xaf   : > { %446 = vmatmul.bf16.vlgmr.msra.gmra.mxu0 %v341_v13  ;;  %459 = vmatmul.bf16.vlgmr.msra.gmra.mxu1 %v341_v13 }
 0x12c   : > { %v447_v14 = vpop.f32.mrf.mxu0  ;;  %v460_v15 = vpop.f32.mrf.mxu1 }
 0x12d   : > { %464 = vst [vmem:[%s269_s29] sm:$0xff] %v447_v14 }
 0x12e   : > { %465 = vst [vmem:[%s269_s29 + $0x8] sm:$0xff] %v460_v15 }
 0x134   : > { %v449_v16 = vpop.f32.mrf.mxu0  ;;  %v462_v17 = vpop.f32.mrf.mxu1 }
 0x135 PF: > { %p11_p9 = scmp.ge.s32.totalorder %s727_s19, 4   ;;  %s799_s15 = smov %s678_s16 }
 0x136   : > { %s800_s16 = smov %s736_s22  ;;  %s801_s17 = smov %s727_s19 }
 0x137   :  { %13 = sbr.rel (!%p11_p9) target bundleno = 2 (0x2), region = 112 }

</bundles_post_ra>
